<compile_context>
chip_gen: v7x
topology: tpu7x:2x2x1
jax: 0.10.0
libtpu: 0.0.40
codegen_flags: <defaults>
</compile_context>

<pallas_src>
import jax
import jax.numpy as jnp
from jax.experimental import pallas as pl
from jax.experimental.pallas import tpu as pltpu


def _round_up(x, m):
    return (x + m - 1) // m * m


def _critic_kernel(sa_ref,
                   w1_ref, b1_ref,
                   w2a_ref, b2a_ref, w2b_ref, b2b_ref,
                   w3a_ref, w3b_ref, b3_ref,
                   q_ref):
    H = w2a_ref.shape[0]  # hidden width (256)

    # Layer 1, fused over both heads: single [TB, S+A] x [S+A, 2H] MXU dot,
    # f32 accumulation, f32 bias + ReLU on the VPU, bf16 copy to feed layer 2.
    h1 = jnp.dot(sa_ref[...], w1_ref[...],
                 preferred_element_type=jnp.float32) + b1_ref[...]
    h1 = jnp.maximum(h1, 0.0).astype(w2a_ref.dtype)

    # Layer 2: per-head 256x256 MXU dots (inputs differ between heads).
    # The 256-lane-aligned slices of h1 lower as views.
    h2a = jnp.maximum(
        jnp.dot(h1[:, :H], w2a_ref[...],
                preferred_element_type=jnp.float32) + b2a_ref[...], 0.0)
    h2b = jnp.maximum(
        jnp.dot(h1[:, H:], w2b_ref[...],
                preferred_element_type=jnp.float32) + b2b_ref[...], 0.0)

    # Layer 3 off the MXU: broadcast multiply (VPU) + row reduce (XLU) in f32.
    q1 = jnp.sum(h2a * w3a_ref[...], axis=-1, keepdims=True)   # [TB, 1]
    q2 = jnp.sum(h2b * w3b_ref[...], axis=-1, keepdims=True)   # [TB, 1]
    q_ref[...] = jnp.concatenate([q1, q2], axis=-1) + b3_ref[...]


def critic_forward(state, action, params, *, block_b=512):
    """state: [B, S] f32, action: [B, A] f32.  Returns (q1, q2) each [B, 1] f32."""
    w1, b1, w2a, b2a, w2b, b2b, w3a, w3b, b3 = params
    B, S = state.shape
    A = action.shape[1]
    H = w2a.shape[0]

    # Tile: multiple of 16 rows (bf16 sublane packing); sized so the grid has
    # >= 2 steps whenever B > 16 (v7x megacore), capped at block_b (<=512 keeps
    # per-step f32 temporaries small on every chip's VMEM budget).
    TB = min(block_b, _round_up(pl.cdiv(max(B, 1), 2), 16))
    TB = max(TB, 16)
    Bp = _round_up(B, TB)

    cdt = w1.dtype  # MXU-input compute dtype (bf16)
    sa = jnp.concatenate([state, action], axis=1).astype(cdt)   # [B, S+A]
    if Bp != B:
        sa = jnp.pad(sa, ((0, Bp - B), (0, 0)))

    grid = (Bp // TB,)

    def resident(arr):  # full-array block, constant index map -> stays in VMEM
        return pl.BlockSpec(arr.shape, lambda i: (0, 0))

    flops = 2 * Bp * ((S + A) * 2 * H + 2 * H * H + 2 * H)
    bytes_accessed = (sa.size * sa.dtype.itemsize
                      + sum(int(p.size) * p.dtype.itemsize for p in params)
                      + Bp * 2 * 4)

    q = pl.pallas_call(
        _critic_kernel,
        out_shape=jax.ShapeDtypeStruct((Bp, 2), jnp.float32),
        grid=grid,
        in_specs=[pl.BlockSpec((TB, S + A), lambda i: (i, 0)),
                  resident(w1), resident(b1),
                  resident(w2a), resident(b2a),
                  resident(w2b), resident(b2b),
                  resident(w3a), resident(w3b), resident(b3)],
        out_specs=pl.BlockSpec((TB, 2), lambda i: (i, 0)),
        compiler_params=pltpu.CompilerParams(
            dimension_semantics=("parallel",),
            vmem_limit_bytes=32 * 1024 * 1024),
        cost_estimate=pl.CostEstimate(flops=flops, transcendentals=0,
                                      bytes_accessed=bytes_accessed),
    )(sa, w1, b1, w2a, b2a, w2b, b2b, w3a, w3b, b3)

    q = q[:B]
    return q[:, 0:1], q[:, 1:2]


def init_critic_params(key, state_dim, action_dim, hidden=256,
                       weight_dtype=jnp.bfloat16):
    """nn.Linear-style init (uniform +-1/sqrt(fan_in)), packed for the kernel.

    Packed layout:
      w1  [S+A, 2H] bf16, b1 [1, 2H] f32      (layer 1 fused over heads)
      w2a [H, H] bf16, b2a [1, H] f32          (layer 2, head 1)
      w2b [H, H] bf16, b2b [1, H] f32          (layer 2, head 2)
      w3a [1, H] f32, w3b [1, H] f32, b3 [1, 2] f32   (layer 3, VPU reduce)
    """
    in_dim = state_dim + action_dim
    dims = [(in_dim, hidden), (hidden, hidden), (hidden, 1)]
    heads = []
    for _ in range(2):
        layers = []
        for fan_in, fan_out in dims:
            key, kw, kb = jax.random.split(key, 3)
            bound = fan_in ** -0.5
            w = jax.random.uniform(kw, (fan_in, fan_out), jnp.float32,
                                   minval=-bound, maxval=bound)
            b = jax.random.uniform(kb, (1, fan_out), jnp.float32,
                                   minval=-bound, maxval=bound)
            layers.append((w, b))
        heads.append(layers)

    (w1_h1, b1_h1), (w2_h1, b2_h1), (w3_h1, b3_h1) = heads[0]
    (w1_h2, b1_h2), (w2_h2, b2_h2), (w3_h2, b3_h2) = heads[1]

    # Layer 1: concatenate heads column-wise -> one [S+A, 2H] weight.
    w1 = jnp.concatenate([w1_h1, w1_h2], axis=1).astype(weight_dtype)
    b1 = jnp.concatenate([b1_h1, b1_h2], axis=1)                 # [1, 2H] f32

    w2a = w2_h1.astype(weight_dtype)
    b2a = b2_h1
    w2b = w2_h2.astype(weight_dtype)
    b2b = b2_h2

    # Layer 3: keep per-head rows in f32 for the VPU multiply + reduce.
    w3a = w3_h1[:, 0][None, :]                                   # [1, H] f32
    w3b = w3_h2[:, 0][None, :]                                   # [1, H] f32
    b3 = jnp.concatenate([b3_h1, b3_h2], axis=1)                 # [1, 2] f32

    return (w1, b1, w2a, b2a, w2b, b2b, w3a, w3b, b3)


def critic_reference(state, action, params):
    """Plain-JAX reference replicating the kernel's dtype flow."""
    w1, b1, w2a, b2a, w2b, b2b, w3a, w3b, b3 = params
    H = w2a.shape[0]
    sa = jnp.concatenate([state, action], axis=1).astype(w1.dtype)
    h1 = jnp.dot(sa, w1, preferred_element_type=jnp.float32) + b1
    h1 = jnp.maximum(h1, 0.0).astype(w2a.dtype)
    h2a = jnp.maximum(
        jnp.dot(h1[:, :H], w2a, preferred_element_type=jnp.float32) + b2a, 0.0)
    h2b = jnp.maximum(
        jnp.dot(h1[:, H:], w2b, preferred_element_type=jnp.float32) + b2b, 0.0)
    q1 = jnp.sum(h2a * w3a, axis=-1, keepdims=True) + b3[:, 0:1]
    q2 = jnp.sum(h2b * w3b, axis=-1, keepdims=True) + b3[:, 1:2]
    return q1, q2


if __name__ == "__main__":
    # Small synthetic shapes (Humanoid obs/act dims not needed for the kernel).
    B, STATE_DIM, ACTION_DIM = 4, 24, 8

    key = jax.random.PRNGKey(0)
    key, ks, ka = jax.random.split(key, 3)
    state = jax.random.normal(ks, (B, STATE_DIM), jnp.float32)
    action = jax.random.normal(ka, (B, ACTION_DIM), jnp.float32)

    params = init_critic_params(key, STATE_DIM, ACTION_DIM)

    q1, q2 = critic_forward(state, action, params)
    q1 = jax.block_until_ready(q1)
    q2 = jax.block_until_ready(q2)

    q1_ref, q2_ref = critic_reference(state, action, params)
    assert q1.shape == (B, 1) and q2.shape == (B, 1)
    assert jnp.allclose(q1, q1_ref, atol=2e-2, rtol=2e-2)
    assert jnp.allclose(q2, q2_ref, atol=2e-2, rtol=2e-2)

    print("KERNEL_OK")
</pallas_src>

<mosaic_0001>
module attributes {stable_mosaic.version = 11 : i64} {
  func.func @_critic_kernel(%arg0: i32, %arg1: memref<16x32xbf16, #tpu.memory_space<vmem>>, %arg2: memref<32x512xbf16, #tpu.memory_space<vmem>>, %arg3: memref<1x512xf32, #tpu.memory_space<vmem>>, %arg4: memref<256x256xbf16, #tpu.memory_space<vmem>>, %arg5: memref<1x256xf32, #tpu.memory_space<vmem>>, %arg6: memref<256x256xbf16, #tpu.memory_space<vmem>>, %arg7: memref<1x256xf32, #tpu.memory_space<vmem>>, %arg8: memref<1x256xf32, #tpu.memory_space<vmem>>, %arg9: memref<1x256xf32, #tpu.memory_space<vmem>>, %arg10: memref<1x2xf32, #tpu.memory_space<vmem>>, %arg11: memref<16x2xf32, #tpu.memory_space<vmem>>) attributes {dimension_semantics = [#tpu.dimension_semantics<parallel>], iteration_bounds = array<i64: 1>, scalar_prefetch = 0 : i64, scratch_operands = 0 : i64, tpu.core_type = #tpu.core_type<tc>, window_params = [{transform_indices = @transform_0, window_bounds = array<i64: 16, 32>}, {pipeline_mode = #tpu.pipeline_mode<synchronous>, transform_indices = @transform_1, window_bounds = array<i64: 32, 512>}, {pipeline_mode = #tpu.pipeline_mode<synchronous>, transform_indices = @transform_2, window_bounds = array<i64: 1, 512>}, {pipeline_mode = #tpu.pipeline_mode<synchronous>, transform_indices = @transform_3, window_bounds = array<i64: 256, 256>}, {pipeline_mode = #tpu.pipeline_mode<synchronous>, transform_indices = @transform_4, window_bounds = array<i64: 1, 256>}, {pipeline_mode = #tpu.pipeline_mode<synchronous>, transform_indices = @transform_5, window_bounds = array<i64: 256, 256>}, {pipeline_mode = #tpu.pipeline_mode<synchronous>, transform_indices = @transform_6, window_bounds = array<i64: 1, 256>}, {pipeline_mode = #tpu.pipeline_mode<synchronous>, transform_indices = @transform_7, window_bounds = array<i64: 1, 256>}, {pipeline_mode = #tpu.pipeline_mode<synchronous>, transform_indices = @transform_8, window_bounds = array<i64: 1, 256>}, {pipeline_mode = #tpu.pipeline_mode<synchronous>, transform_indices = @transform_9, window_bounds = array<i64: 1, 2>}, {transform_indices = @transform_10, window_bounds = array<i64: 16, 2>}]} {
    %c0 = arith.constant 0 : index
    %c0_0 = arith.constant 0 : index
    %0 = vector.load %arg1[%c0, %c0_0] : memref<16x32xbf16, #tpu.memory_space<vmem>>, vector<16x32xbf16>
    %c0_1 = arith.constant 0 : index
    %c0_2 = arith.constant 0 : index
    %1 = vector.load %arg2[%c0_1, %c0_2] : memref<32x512xbf16, #tpu.memory_space<vmem>>, vector<32x512xbf16>
    %cst = arith.constant dense<0.000000e+00> : vector<16x512xf32>
    %2 = tpu.matmul %0, %1, %cst {dimension_numbers = #tpu.dot_dimension_numbers<[1], [0], [0], [1], [0, 0, 1, 1], [], []>} : vector<16x32xbf16>, vector<32x512xbf16>, vector<16x512xf32> -> vector<16x512xf32>
    %c0_3 = arith.constant 0 : index
    %c0_4 = arith.constant 0 : index
    %3 = vector.load %arg3[%c0_3, %c0_4] : memref<1x512xf32, #tpu.memory_space<vmem>>, vector<1x512xf32>
    %4 = vector.broadcast %3 : vector<1x512xf32> to vector<16x512xf32>
    %5 = arith.addf %2, %4 : vector<16x512xf32>
    %cst_5 = arith.constant 0.000000e+00 : f32
    %6 = vector.broadcast %cst_5 : f32 to vector<16x512xf32>
    %7 = arith.maximumf %5, %6 : vector<16x512xf32>
    %8 = arith.truncf %7 : vector<16x512xf32> to vector<16x512xbf16>
    %9 = vector.extract_strided_slice %8 {offsets = [0, 0], sizes = [16, 256], strides = [1, 1]} : vector<16x512xbf16> to vector<16x256xbf16>
    %c0_6 = arith.constant 0 : index
    %c0_7 = arith.constant 0 : index
    %10 = vector.load %arg4[%c0_6, %c0_7] : memref<256x256xbf16, #tpu.memory_space<vmem>>, vector<256x256xbf16>
    %cst_8 = arith.constant dense<0.000000e+00> : vector<16x256xf32>
    %11 = tpu.matmul %9, %10, %cst_8 {dimension_numbers = #tpu.dot_dimension_numbers<[1], [0], [0], [1], [0, 0, 1, 1], [], []>} : vector<16x256xbf16>, vector<256x256xbf16>, vector<16x256xf32> -> vector<16x256xf32>
    %c0_9 = arith.constant 0 : index
    %c0_10 = arith.constant 0 : index
    %12 = vector.load %arg5[%c0_9, %c0_10] : memref<1x256xf32, #tpu.memory_space<vmem>>, vector<1x256xf32>
    %13 = vector.broadcast %12 : vector<1x256xf32> to vector<16x256xf32>
    %14 = arith.addf %11, %13 : vector<16x256xf32>
    %cst_11 = arith.constant 0.000000e+00 : f32
    %15 = vector.broadcast %cst_11 : f32 to vector<16x256xf32>
    %16 = arith.maximumf %14, %15 : vector<16x256xf32>
    %17 = vector.extract_strided_slice %8 {offsets = [0, 256], sizes = [16, 256], strides = [1, 1]} : vector<16x512xbf16> to vector<16x256xbf16>
    %c0_12 = arith.constant 0 : index
    %c0_13 = arith.constant 0 : index
    %18 = vector.load %arg6[%c0_12, %c0_13] : memref<256x256xbf16, #tpu.memory_space<vmem>>, vector<256x256xbf16>
    %cst_14 = arith.constant dense<0.000000e+00> : vector<16x256xf32>
    %19 = tpu.matmul %17, %18, %cst_14 {dimension_numbers = #tpu.dot_dimension_numbers<[1], [0], [0], [1], [0, 0, 1, 1], [], []>} : vector<16x256xbf16>, vector<256x256xbf16>, vector<16x256xf32> -> vector<16x256xf32>
    %c0_15 = arith.constant 0 : index
    %c0_16 = arith.constant 0 : index
    %20 = vector.load %arg7[%c0_15, %c0_16] : memref<1x256xf32, #tpu.memory_space<vmem>>, vector<1x256xf32>
    %21 = vector.broadcast %20 : vector<1x256xf32> to vector<16x256xf32>
    %22 = arith.addf %19, %21 : vector<16x256xf32>
    %cst_17 = arith.constant 0.000000e+00 : f32
    %23 = vector.broadcast %cst_17 : f32 to vector<16x256xf32>
    %24 = arith.maximumf %22, %23 : vector<16x256xf32>
    %c0_18 = arith.constant 0 : index
    %c0_19 = arith.constant 0 : index
    %25 = vector.load %arg8[%c0_18, %c0_19] : memref<1x256xf32, #tpu.memory_space<vmem>>, vector<1x256xf32>
    %26 = vector.broadcast %25 : vector<1x256xf32> to vector<16x256xf32>
    %27 = arith.mulf %16, %26 : vector<16x256xf32>
    %cst_20 = arith.constant dense<0.000000e+00> : vector<16xf32>
    %28 = vector.multi_reduction <add>, %27, %cst_20 [1] : vector<16x256xf32> to vector<16xf32>
    %29 = vector.shape_cast %28 : vector<16xf32> to vector<16x1xf32>
    %c0_21 = arith.constant 0 : index
    %c0_22 = arith.constant 0 : index
    %30 = vector.load %arg9[%c0_21, %c0_22] : memref<1x256xf32, #tpu.memory_space<vmem>>, vector<1x256xf32>
    %31 = vector.broadcast %30 : vector<1x256xf32> to vector<16x256xf32>
    %32 = arith.mulf %24, %31 : vector<16x256xf32>
    %cst_23 = arith.constant dense<0.000000e+00> : vector<16xf32>
    %33 = vector.multi_reduction <add>, %32, %cst_23 [1] : vector<16x256xf32> to vector<16xf32>
    %34 = vector.shape_cast %33 : vector<16xf32> to vector<16x1xf32>
    %35 = tpu.concatenate %29, %34 in 1 : vector<16x1xf32>, vector<16x1xf32> -> vector<16x2xf32>
    %c0_24 = arith.constant 0 : index
    %c0_25 = arith.constant 0 : index
    %36 = vector.load %arg10[%c0_24, %c0_25] : memref<1x2xf32, #tpu.memory_space<vmem>>, vector<1x2xf32>
    %37 = vector.broadcast %36 : vector<1x2xf32> to vector<16x2xf32>
    %38 = arith.addf %35, %37 : vector<16x2xf32>
    %c0_26 = arith.constant 0 : index
    %c0_27 = arith.constant 0 : index
    %39 = vector.load %arg11[%c0_26, %c0_27] : memref<16x2xf32, #tpu.memory_space<vmem>>, vector<16x2xf32>
    tpu.vector_store %arg11[%c0_26, %c0_27], %38 {strides = array<i32>} : memref<16x2xf32, #tpu.memory_space<vmem>>, vector<16x2xf32>,
    return
  }
  func.func @transform_0(%arg0: i32) -> (i32, i32) {
    %c0_i32 = arith.constant 0 : i32
    %c0_i32_0 = arith.constant 0 : i32
    return %arg0, %c0_i32 : i32, i32
  }
  func.func @transform_1(%arg0: i32) -> (i32, i32) {
    %c0_i32 = arith.constant 0 : i32
    %c0_i32_0 = arith.constant 0 : i32
    %c0_i32_1 = arith.constant 0 : i32
    return %c0_i32, %c0_i32_0 : i32, i32
  }
  func.func @transform_2(%arg0: i32) -> (i32, i32) {
    %c0_i32 = arith.constant 0 : i32
    %c0_i32_0 = arith.constant 0 : i32
    %c0_i32_1 = arith.constant 0 : i32
    return %c0_i32, %c0_i32_0 : i32, i32
  }
  func.func @transform_3(%arg0: i32) -> (i32, i32) {
    %c0_i32 = arith.constant 0 : i32
    %c0_i32_0 = arith.constant 0 : i32
    %c0_i32_1 = arith.constant 0 : i32
    return %c0_i32, %c0_i32_0 : i32, i32
  }
  func.func @transform_4(%arg0: i32) -> (i32, i32) {
    %c0_i32 = arith.constant 0 : i32
    %c0_i32_0 = arith.constant 0 : i32
    %c0_i32_1 = arith.constant 0 : i32
    return %c0_i32, %c0_i32_0 : i32, i32
  }
  func.func @transform_5(%arg0: i32) -> (i32, i32) {
    %c0_i32 = arith.constant 0 : i32
    %c0_i32_0 = arith.constant 0 : i32
    %c0_i32_1 = arith.constant 0 : i32
    return %c0_i32, %c0_i32_0 : i32, i32
  }
  func.func @transform_6(%arg0: i32) -> (i32, i32) {
    %c0_i32 = arith.constant 0 : i32
    %c0_i32_0 = arith.constant 0 : i32
    %c0_i32_1 = arith.constant 0 : i32
    return %c0_i32, %c0_i32_0 : i32, i32
  }
  func.func @transform_7(%arg0: i32) -> (i32, i32) {
    %c0_i32 = arith.constant 0 : i32
    %c0_i32_0 = arith.constant 0 : i32
    %c0_i32_1 = arith.constant 0 : i32
    return %c0_i32, %c0_i32_0 : i32, i32
  }
  func.func @transform_8(%arg0: i32) -> (i32, i32) {
    %c0_i32 = arith.constant 0 : i32
    %c0_i32_0 = arith.constant 0 : i32
    %c0_i32_1 = arith.constant 0 : i32
    return %c0_i32, %c0_i32_0 : i32, i32
  }
  func.func @transform_9(%arg0: i32) -> (i32, i32) {
    %c0_i32 = arith.constant 0 : i32
    %c0_i32_0 = arith.constant 0 : i32
    %c0_i32_1 = arith.constant 0 : i32
    return %c0_i32, %c0_i32_0 : i32, i32
  }
  func.func @transform_10(%arg0: i32) -> (i32, i32) {
    %c0_i32 = arith.constant 0 : i32
    %c0_i32_0 = arith.constant 0 : i32
    return %arg0, %c0_i32 : i32, i32
  }
}

</mosaic_0001>

<bundles_post_ra>
// kernel: tpu_custom_call.1
= control target key start
LH: loop header
LB: loop body
LE: loop exit
PB: predicated region body
PF: predicated region fallthrough
CT: control target
= control target key end

     0   :  { %15 = vsyncpa [#allocation3], 0  ;;  %s1266_s0 = inlined_call_operand.hbm [shape: bf16[16,32], index: 0, kind: input, shape index: {}]   ;;  %s1267_s1 = inlined_call_operand.hbm [shape: bf16[32,512], index: 1, kind: input, shape index: {}]   ;;  %s1268_s2 = inlined_call_operand.vmem [shape: f32[1,512], index: 2, kind: input, shape index: {}]   ;;  %s1269_s3 = inlined_call_operand.hbm [shape: bf16[256,256], index: 3, kind: input, shape index: {}]   ;;  %s1270_s4 = inlined_call_operand.vmem [shape: f32[1,256], index: 4, kind: input, shape index: {}]   ;;  %s1271_s5 = inlined_call_operand.hbm [shape: bf16[256,256], index: 5, kind: input, shape index: {}]   ;;  %s1272_s6 = inlined_call_operand.vmem [shape: f32[1,256], index: 6, kind: input, shape index: {}]   ;;  %s1273_s7 = inlined_call_operand.vmem [shape: f32[1,256], index: 7, kind: input, shape index: {}]   ;;  %s1274_s8 = inlined_call_operand.vmem [shape: f32[1,256], index: 8, kind: input, shape index: {}]   ;;  %s1275_s9 = inlined_call_operand.vmem [shape: f32[1,2], index: 9, kind: input, shape index: {}]   ;;  %s1276_s10 = inlined_call_operand.vmem [shape: f32[16,2], index: 10, kind: output, shape index: {}]  }
   0x1   :  { %16 = vsyncpa [#allocation5], 0 }
   0x2   :  { %17 = vsyncpa [#allocation8], 0  ;;  %s1128_s13 = smov [#allocation4]   ;;  %s1034_s17 = scalar_lea.hbm %s1267_s1, 1024 }
   0x3   :  { %s35_s14 = sshll.u32 %s1128_s13, 4  ;;  %p1035_p0 = scmp.ne.s32.totalorder %s1267_s1, %s1034_s17  ;;  %s36_s14 = int_to_ptr.vmem [resolvable:$true] %s35_s14 }
   0x4   :  { %p1038_p1 = scmp.lt.u32.totalorder %s1034_s17, %s1267_s1 }
   0x6   :  { %p1040_p2 = pnand %p1038_p1, %p1035_p0 }
   0x8   :  { %1043 = shalt.err (!%p1040_p2)
}
   0x9   :  { %s1044_s22 = scalar_lea.vmem %s36_s14, 1024  ;;  %p1049_p4 = scmp.lt.s32.totalorder %s36_s14, %s36_s14 }
   0xa   :  { %p1045_p3 = scmp.ne.s32.totalorder %s36_s14, %s1044_s22  ;;  %p1050_p5 = scmp.lt.s32.totalorder %s1044_s22, %s1044_s22 }
   0xc   :  { %p1051_p6 = por %p1050_p5, %p1049_p4 }
   0xe   :  { %p1052_p7 = pnand %p1051_p6, %p1045_p3 }
  0x10   :  { %1055 = shalt.err (!%p1052_p7)
}
  0x11   :  { %s1129_s23 = smov 256   ;;  %s1130_s24 = smov 16  }
  0x12   :  { %41 = dma.hbm_to_vmem [thread:$0]  %s1267_s1, 1024, %s36_s14, [#allocation5], %s1129_s23, %s1129_s23, %s1130_s24  }
  0x13   :  { %s1131_s27 = smov [#allocation2]   ;;  %s1056_s11 = scalar_lea.hbm %s1266_s0, 128 }
  0x14   :  { %s23_s28 = sshll.u32 %s1131_s27, 4  ;;  %p1057_p8 = scmp.ne.s32.totalorder %s1266_s0, %s1056_s11  ;;  %s24_s28 = int_to_ptr.vmem [resolvable:$true] %s23_s28 }
  0x15   :  { %p1060_p9 = scmp.lt.u32.totalorder %s1056_s11, %s1266_s0 }
  0x17   :  { %p1062_p10 = pnand %p1060_p9, %p1057_p8 }
  0x19   :  { %1065 = shalt.err (!%p1062_p10)
}
  0x1a   :  { %s1066_s17 = scalar_lea.vmem %s24_s28, 128  ;;  %p1071_p12 = scmp.lt.s32.totalorder %s24_s28, %s24_s28 }
  0x1b   :  { %p1067_p11 = scmp.ne.s32.totalorder %s24_s28, %s1066_s17  ;;  %p1072_p13 = scmp.lt.s32.totalorder %s1066_s17, %s1066_s17 }
  0x1d   :  { %p1073_p0 = por %p1072_p13, %p1071_p12 }
  0x1f   :  { %p1074_p1 = pnand %p1073_p0, %p1067_p11 }
  0x21   :  { %1077 = shalt.err (!%p1074_p1)
}
  0x22   :  { %s1132_s1 = smov 64   ;;  %s1133_s14 = smov 4  }
  0x23   :  { %29 = dma.hbm_to_vmem [thread:$0]  %s1266_s0, 128, %s24_s28, [#allocation3], %s1132_s1, %s1132_s1, %s1133_s14  }
  0x24   :  { %s1134_s20 = smov [#allocation6]   ;;  %s1078_s24 = scalar_lea.hbm %s1269_s3, 4096 }
  0x25   :  { %s49_s21 = sshll.u32 %s1134_s20, 4  ;;  %p1079_p2 = scmp.ne.s32.totalorder %s1269_s3, %s1078_s24  ;;  %s50_s21 = int_to_ptr.vmem [resolvable:$true] %s49_s21 }
  0x26   :  { %p1082_p3 = scmp.lt.u32.totalorder %s1078_s24, %s1269_s3 }
  0x28   :  { %p1084_p4 = pnand %p1082_p3, %p1079_p2 }
  0x2a   :  { %1087 = shalt.err (!%p1084_p4)
}
  0x2b   :  { %s1088_s30 = scalar_lea.vmem %s50_s21, 4096  ;;  %p1093_p6 = scmp.lt.s32.totalorder %s50_s21, %s50_s21 }
  0x2c   :  { %p1089_p5 = scmp.ne.s32.totalorder %s50_s21, %s1088_s30  ;;  %p1094_p7 = scmp.lt.s32.totalorder %s1088_s30, %s1088_s30 }
  0x2e   :  { %p1095_p8 = por %p1094_p7, %p1093_p6 }
  0x30   :  { %p1096_p9 = pnand %p1095_p8, %p1089_p5 }
  0x32   :  { %1099 = shalt.err (!%p1096_p9)
}
  0x33   :  { %s1135_s0 = smov 128   ;;  %s1136_s28 = smov 8  }
  0x34   :  { %55 = dma.hbm_to_vmem [thread:$0]  %s1269_s3, 4096, %s50_s21, [#allocation5], %s1135_s0, %s1135_s0, %s1136_s28  }
  0x35   :  { %s1137_s13 = smov [#allocation7]   ;;  %s1100_s1 = scalar_lea.hbm %s1271_s5, 4096 }
  0x36   :  { %s63_s15 = sshll.u32 %s1137_s13, 4  ;;  %p1101_p10 = scmp.ne.s32.totalorder %s1271_s5, %s1100_s1  ;;  %s64_s15 = int_to_ptr.vmem [resolvable:$true] %s63_s15 }
  0x37   :  { %p1104_p11 = scmp.lt.u32.totalorder %s1100_s1, %s1271_s5 }
  0x39   :  { %p1106_p12 = pnand %p1104_p11, %p1101_p10 }
  0x3b   :  { %1109 = shalt.err (!%p1106_p12)
}
  0x3c   :  { %s1110_s22 = scalar_lea.vmem %s64_s15, 4096  ;;  %p1115_p0 = scmp.lt.s32.totalorder %s64_s15, %s64_s15 }
  0x3d   :  { %p1111_p13 = scmp.ne.s32.totalorder %s64_s15, %s1110_s22  ;;  %p1116_p1 = scmp.lt.s32.totalorder %s1110_s22, %s1110_s22 }
  0x3f   :  { %p1117_p2 = por %p1116_p1, %p1115_p0 }
  0x41   :  { %p1118_p3 = pnand %p1117_p2, %p1111_p13 }
  0x43   :  { %1121 = shalt.err (!%p1118_p3)
}
  0x44   :  { %69 = dma.hbm_to_vmem [thread:$0]  %s1271_s5, 4096, %s64_s15, [#allocation8], %s1135_s0, %s1135_s0, %s1136_s28  }
  0x45   :  { %1122 = dma.done.wait [#allocation3], 128  }
  0x46   :  { %1123 = vsyncadd [#allocation3], 4294967168 }
  0x47   :  { %1124 = dma.done.wait [#allocation5], 5120  }
  0x48   :  { %1125 = vsyncadd [#allocation5], 4294962176 }
  0x49   :  { %1126 = dma.done.wait [#allocation8], 4096  }
  0x4a   :  { %1127 = vsyncadd [#allocation8], 4294963200  ;;  %v1138_v0 = vmov 0   ;;  %v925_v1 = vld [vmem:[#allocation4 + $0x4] ss:$16 sps:$4 sm:$0xff]   ;;  %v937_v9 = vld [vmem:[#allocation2] sm:$0xff]  }
  0x4b   :  { %204 = vmatprep.mubr.bf16.mxu0 %v1138_v0  ;;  %247 = vmatprep.mubr.bf16.mxu1 %v1138_v0  ;;  %v927_v2 = vld [vmem:[#allocation4 + $0xc] ss:$16 sps:$4 sm:$0xff]   ;;  %v929_v3 = vld [vmem:[#allocation4] ss:$16 sps:$4 sm:$0xff]   ;;  %v930_v4 = vld [vmem:[#allocation4 + $0x8] ss:$16 sps:$4 sm:$0xff]  }
  0x4c   :  { %172 = vmatprep.subr.bf16.mxu0 %v925_v1  ;;  %215 = vmatprep.subr.bf16.mxu1 %v927_v2  ;;  %v931_v5 = vld [vmem:[#allocation4 + $0x24] ss:$16 sps:$4 sm:$0xff]   ;;  %v933_v6 = vld [vmem:[#allocation4 + $0x2c] ss:$16 sps:$4 sm:$0xff]   ;;  %v935_v7 = vld [vmem:[#allocation4 + $0x20] ss:$16 sps:$4 sm:$0xff]  }
  0x4d   :  { %173 = vmatpush1.bf16.msra.mxu0 %v929_v3  ;;  %216 = vmatpush1.bf16.msra.mxu1 %v930_v4  ;;  %v936_v8 = vld [vmem:[#allocation4 + $0x28] ss:$16 sps:$4 sm:$0xff]   ;;  %v940_v11 = vld [vmem:[#allocation6 + $0x4] ss:$8 sps:$4 sm:$0xff]   ;;  %vm168_vm0 = vcmask 261120   ;;  %vm816_vm1 = vcmask 7168  }
  0x4e   :  { %174 = vmatprep.subr.bf16.mxu0 %v931_v5  ;;  %217 = vmatprep.subr.bf16.mxu1 %v933_v6  ;;  %v938_v10 = vld [vmem:[#allocation6] ss:$8 sps:$4 sm:$0xff]   ;;  %v943_v13 = vld [vmem:[#allocation7 + $0x4] ss:$8 sps:$4 sm:$0xff]   ;;  %v946_v14 = vld [vmem:[#allocation6 + $0x14] ss:$8 sps:$4 sm:$0xff]  }
  0x4f   :  { %v941_v12 = vld [vmem:[#allocation7] ss:$8 sps:$4 sm:$0xff]   ;;  %v949_v15 = vld [vmem:[#allocation7 + $0x14] ss:$8 sps:$4 sm:$0xff]   ;;  %v944_v16 = vld [vmem:[#allocation6 + $0x10] ss:$8 sps:$4 sm:$0xff]  }
  0x50   :  { %v947_v17 = vld [vmem:[#allocation7 + $0x10] ss:$8 sps:$4 sm:$0xff]   ;;  %v952_v18 = vld [vmem:[#allocation6 + $0x24] ss:$8 sps:$4 sm:$0xff]   ;;  %v950_v20 = vld [vmem:[#allocation6 + $0x20] ss:$8 sps:$4 sm:$0xff]  }
  0x51   :  { %175 = vmatpush1.bf16.msra.mxu0 %v935_v7  ;;  %218 = vmatpush1.bf16.msra.mxu1 %v936_v8  ;;  %v955_v19 = vld [vmem:[#allocation7 + $0x24] ss:$8 sps:$4 sm:$0xff]   ;;  %v953_v21 = vld [vmem:[#allocation7 + $0x20] ss:$8 sps:$4 sm:$0xff]   ;;  %v958_v22 = vld [vmem:[#allocation6 + $0x34] ss:$8 sps:$4 sm:$0xff]  }
  0x52   :  { %474 = vmatprep.subr.bf16.mxu0 %v940_v11  ;;  %725 = vmatprep.subr.bf16.mxu1 %v943_v13  ;;  %v961_v23 = vld [vmem:[#allocation7 + $0x34] ss:$8 sps:$4 sm:$0xff]   ;;  %v956_v24 = vld [vmem:[#allocation6 + $0x30] ss:$8 sps:$4 sm:$0xff]   ;;  %v964_v26 = vld [vmem:[#allocation6 + $0x44] ss:$8 sps:$4 sm:$0xff]  }
  0x53   :  { %v959_v25 = vld [vmem:[#allocation7 + $0x30] ss:$8 sps:$4 sm:$0xff]   ;;  %v967_v27 = vld [vmem:[#allocation7 + $0x44] ss:$8 sps:$4 sm:$0xff]   ;;  %v962_v28 = vld [vmem:[#allocation6 + $0x40] ss:$8 sps:$4 sm:$0xff]  }
  0x54   :  { %847 = vmatmul.mubr.msk.bf16.vlgmr.msra.gmra.mrb[0].mxu0 %vm168_vm0, %v937_v9  ;;  %848 = vmatmul.mubr.msk.bf16.vlgmr.msra.gmra.mrb[0].mxu1 %vm168_vm0, %v937_v9  ;;  %v965_v29 = vld [vmem:[#allocation7 + $0x40] ss:$8 sps:$4 sm:$0xff]   ;;  %v970_v30 = vld [vmem:[#allocation6 + $0x54] ss:$8 sps:$4 sm:$0xff]   ;;  %v968_v32 = vld [vmem:[#allocation6 + $0x50] ss:$8 sps:$4 sm:$0xff]  }
  0x55   :  { %475 = vmatpush1.bf16.msra.mxu0 %v938_v10  ;;  %726 = vmatpush1.bf16.msra.mxu1 %v941_v12  ;;  %v973_v31 = vld [vmem:[#allocation7 + $0x54] ss:$8 sps:$4 sm:$0xff]   ;;  %v971_v33 = vld [vmem:[#allocation7 + $0x50] ss:$8 sps:$4 sm:$0xff]   ;;  %v976_v34 = vld [vmem:[#allocation6 + $0x64] ss:$8 sps:$4 sm:$0xff]   ;;  %v103_v10 = vlaneseq }
  0x56   :  { %476 = vmatprep.subr.bf16.mxu0 %v946_v14  ;;  %727 = vmatprep.subr.bf16.mxu1 %v949_v15  ;;  %v979_v35 = vld [vmem:[#allocation7 + $0x64] ss:$8 sps:$4 sm:$0xff]   ;;  %v974_v36 = vld [vmem:[#allocation6 + $0x60] ss:$8 sps:$4 sm:$0xff]   ;;  %v982_v38 = vld [vmem:[#allocation6 + $0x74] ss:$8 sps:$4 sm:$0xff]  }
  0x57   :  { %v977_v37 = vld [vmem:[#allocation7 + $0x60] ss:$8 sps:$4 sm:$0xff]   ;;  %v985_v39 = vld [vmem:[#allocation7 + $0x74] ss:$8 sps:$4 sm:$0xff]   ;;  %v980_v40 = vld [vmem:[#allocation6 + $0x70] ss:$8 sps:$4 sm:$0xff]  }
  0x58   :  { %v983_v41 = vld [vmem:[#allocation7 + $0x70] ss:$8 sps:$4 sm:$0xff]   ;;  %v988_v42 = vld [vmem:[#allocation6 + $0x84] ss:$8 sps:$4 sm:$0xff]   ;;  %v986_v44 = vld [vmem:[#allocation6 + $0x80] ss:$8 sps:$4 sm:$0xff]  }
  0x59   :  { %477 = vmatpush1.bf16.msra.mxu0 %v944_v16  ;;  %728 = vmatpush1.bf16.msra.mxu1 %v947_v17  ;;  %v991_v43 = vld [vmem:[#allocation7 + $0x84] ss:$8 sps:$4 sm:$0xff]   ;;  %v989_v45 = vld [vmem:[#allocation7 + $0x80] ss:$8 sps:$4 sm:$0xff]   ;;  %v994_v46 = vld [vmem:[#allocation6 + $0x94] ss:$8 sps:$4 sm:$0xff]  }
  0x5a   :  { %478 = vmatprep.subr.bf16.mxu0 %v952_v18  ;;  %729 = vmatprep.subr.bf16.mxu1 %v955_v19  ;;  %v997_v47 = vld [vmem:[#allocation7 + $0x94] ss:$8 sps:$4 sm:$0xff]   ;;  %v992_v48 = vld [vmem:[#allocation6 + $0x90] ss:$8 sps:$4 sm:$0xff]   ;;  %v1000_v50 = vld [vmem:[#allocation6 + $0xa4] ss:$8 sps:$4 sm:$0xff]  }
  0x5b   :  { %v995_v49 = vld [vmem:[#allocation7 + $0x90] ss:$8 sps:$4 sm:$0xff]   ;;  %v1003_v51 = vld [vmem:[#allocation7 + $0xa4] ss:$8 sps:$4 sm:$0xff]   ;;  %v998_v52 = vld [vmem:[#allocation6 + $0xa0] ss:$8 sps:$4 sm:$0xff]  }
  0x5c   :  { %v1001_v53 = vld [vmem:[#allocation7 + $0xa0] ss:$8 sps:$4 sm:$0xff]   ;;  %v1006_v54 = vld [vmem:[#allocation6 + $0xb4] ss:$8 sps:$4 sm:$0xff]   ;;  %v1004_v56 = vld [vmem:[#allocation6 + $0xb0] ss:$8 sps:$4 sm:$0xff]  }
  0x5d   :  { %479 = vmatpush1.bf16.msra.mxu0 %v950_v20  ;;  %730 = vmatpush1.bf16.msra.mxu1 %v953_v21  ;;  %v1009_v55 = vld [vmem:[#allocation7 + $0xb4] ss:$8 sps:$4 sm:$0xff]   ;;  %v1007_v57 = vld [vmem:[#allocation7 + $0xb0] ss:$8 sps:$4 sm:$0xff]   ;;  %v1012_v58 = vld [vmem:[#allocation6 + $0xc4] ss:$8 sps:$4 sm:$0xff]  }
  0x5e   :  { %480 = vmatprep.subr.bf16.mxu0 %v958_v22  ;;  %731 = vmatprep.subr.bf16.mxu1 %v961_v23  ;;  %v1015_v59 = vld [vmem:[#allocation7 + $0xc4] ss:$8 sps:$4 sm:$0xff]   ;;  %v1010_v60 = vld [vmem:[#allocation6 + $0xc0] ss:$8 sps:$4 sm:$0xff]   ;;  %v1018_v62 = vld [vmem:[#allocation6 + $0xd4] ss:$8 sps:$4 sm:$0xff]  }
  0x5f   :  { %v1013_v61 = vld [vmem:[#allocation7 + $0xc0] ss:$8 sps:$4 sm:$0xff]   ;;  %v1021_v63 = vld [vmem:[#allocation7 + $0xd4] ss:$8 sps:$4 sm:$0xff]   ;;  %v1016_v0 = vld [vmem:[#allocation6 + $0xd0] ss:$8 sps:$4 sm:$0xff]  }
  0x60   :  { %v1019_v1 = vld [vmem:[#allocation7 + $0xd0] ss:$8 sps:$4 sm:$0xff]   ;;  %v1024_v2 = vld [vmem:[#allocation6 + $0xe4] ss:$8 sps:$4 sm:$0xff]   ;;  %v1022_v4 = vld [vmem:[#allocation6 + $0xe0] ss:$8 sps:$4 sm:$0xff]  }
  0x61   :  { %481 = vmatpush1.bf16.msra.mxu0 %v956_v24  ;;  %732 = vmatpush1.bf16.msra.mxu1 %v959_v25  ;;  %v1027_v3 = vld [vmem:[#allocation7 + $0xe4] ss:$8 sps:$4 sm:$0xff]   ;;  %v1025_v5 = vld [vmem:[#allocation7 + $0xe0] ss:$8 sps:$4 sm:$0xff]   ;;  %v1030_v6 = vld [vmem:[#allocation6 + $0xf4] ss:$8 sps:$4 sm:$0xff]  }
  0x62   :  { %482 = vmatprep.subr.bf16.mxu0 %v964_v26  ;;  %733 = vmatprep.subr.bf16.mxu1 %v967_v27  ;;  %v1033_v7 = vld [vmem:[#allocation7 + $0xf4] ss:$8 sps:$4 sm:$0xff]   ;;  %v1028_v8 = vld [vmem:[#allocation6 + $0xf0] ss:$8 sps:$4 sm:$0xff]   ;;  %v104_v11 = vshrl.u32 %v103_v10, 7  ;;  %vm828_vm2 = vcmask 15360  }
  0x63   :  { %v1031_v9 = vld [vmem:[#allocation7 + $0xf0] ss:$8 sps:$4 sm:$0xff]   ;;  %v101_v14 = vld [vmem:[%s1268_s2] sm:$0xf] }
  0x64   :  { %v105_v12 = vsub.s32 0, %v104_v11  ;;  %v113_v13 = vsub.s32 2, %v104_v11  ;;  %v109_v15 = vsub.s32 1, %v104_v11  ;;  %v117_v16 = vsub.s32 3, %v104_v11 }
  0x65   :  { %483 = vmatpush1.bf16.msra.mxu0 %v962_v28  ;;  %734 = vmatpush1.bf16.msra.mxu1 %v965_v29 }
  0x66   :  { %484 = vmatprep.subr.bf16.mxu0 %v970_v30  ;;  %735 = vmatprep.subr.bf16.mxu1 %v973_v31  ;;  %v106_v17 = vrot.slane %v101_v14, %v105_v12  ;;  %v114_v18 = vrot.slane %v101_v14, %v113_v13  ;;  %v110_v19 = vrot.slane %v101_v14, %v109_v15 }
  0x67   :  { %v118_v20 = vrot.slane %v101_v14, %v117_v16 }
  0x69   :  { %485 = vmatpush1.bf16.msra.mxu0 %v968_v32  ;;  %736 = vmatpush1.bf16.msra.mxu1 %v971_v33 }
  0x6a   :  { %486 = vmatprep.subr.bf16.mxu0 %v976_v34  ;;  %737 = vmatprep.subr.bf16.mxu1 %v979_v35 }
  0x6d   :  { %487 = vmatpush1.bf16.msra.mxu0 %v974_v36  ;;  %738 = vmatpush1.bf16.msra.mxu1 %v977_v37 }
  0x6e   :  { %488 = vmatprep.subr.bf16.mxu0 %v982_v38  ;;  %739 = vmatprep.subr.bf16.mxu1 %v985_v39 }
  0x71   :  { %489 = vmatpush1.bf16.msra.mxu0 %v980_v40  ;;  %740 = vmatpush1.bf16.msra.mxu1 %v983_v41 }
  0x72   :  { %490 = vmatprep.subr.bf16.mxu0 %v988_v42  ;;  %741 = vmatprep.subr.bf16.mxu1 %v991_v43 }
  0x75   :  { %491 = vmatpush1.bf16.msra.mxu0 %v986_v44  ;;  %742 = vmatpush1.bf16.msra.mxu1 %v989_v45 }
  0x76   :  { %492 = vmatprep.subr.bf16.mxu0 %v994_v46  ;;  %743 = vmatprep.subr.bf16.mxu1 %v997_v47 }
  0x79   :  { %493 = vmatpush1.bf16.msra.mxu0 %v992_v48  ;;  %744 = vmatpush1.bf16.msra.mxu1 %v995_v49  ;;  %v302_v49 = vld [vmem:[%s1270_s4] sm:$0x3] }
  0x7a   :  { %494 = vmatprep.subr.bf16.mxu0 %v1000_v50  ;;  %745 = vmatprep.subr.bf16.mxu1 %v1003_v51  ;;  %v553_v50 = vld [vmem:[%s1272_s6] sm:$0x3]  ;;  %v307_v51 = vrot.slane %v302_v49, %v105_v12 }
  0x7d   :  { %495 = vmatpush1.bf16.msra.mxu0 %v998_v52  ;;  %746 = vmatpush1.bf16.msra.mxu1 %v1001_v53  ;;  %v558_v52 = vrot.slane %v553_v50, %v105_v12  ;;  %v311_v53 = vrot.slane %v302_v49, %v109_v15 }
  0x7e   :  { %496 = vmatprep.subr.bf16.mxu0 %v1006_v54  ;;  %747 = vmatprep.subr.bf16.mxu1 %v1009_v55  ;;  %v562_v54 = vrot.slane %v553_v50, %v109_v15  ;;  %v772_v55 = vld [vmem:[%s1273_s7] sm:$0x3] }
  0x81   :  { %497 = vmatpush1.bf16.msra.mxu0 %v1004_v56  ;;  %748 = vmatpush1.bf16.msra.mxu1 %v1007_v57  ;;  %v794_v56 = vld [vmem:[%s1274_s8] sm:$0x3] }
  0x82   :  { %498 = vmatprep.subr.bf16.mxu0 %v1012_v58  ;;  %749 = vmatprep.subr.bf16.mxu1 %v1015_v59 }
  0x85   :  { %499 = vmatpush1.bf16.msra.mxu0 %v1010_v60  ;;  %750 = vmatpush1.bf16.msra.mxu1 %v1013_v61 }
  0x86   :  { %500 = vmatprep.subr.bf16.mxu0 %v1018_v62  ;;  %751 = vmatprep.subr.bf16.mxu1 %v1021_v63  ;;  %v777_v63 = vrot.slane %v772_v55, %v105_v12 }
  0x89   :  { %501 = vmatpush1.bf16.msra.mxu0 %v1016_v0  ;;  %752 = vmatpush1.bf16.msra.mxu1 %v1019_v1  ;;  %v799_v0 = vrot.slane %v794_v56, %v105_v12 }
  0x8a   :  { %502 = vmatprep.subr.bf16.mxu0 %v1024_v2  ;;  %753 = vmatprep.subr.bf16.mxu1 %v1027_v3 }
  0x8d   :  { %503 = vmatpush1.bf16.msra.mxu0 %v1022_v4  ;;  %754 = vmatpush1.bf16.msra.mxu1 %v1025_v5  ;;  %v781_v5 = vrot.slane %v772_v55, %v109_v15 }
  0x8e   :  { %504 = vmatprep.subr.bf16.mxu0 %v1030_v6  ;;  %755 = vmatprep.subr.bf16.mxu1 %v1033_v7  ;;  %v803_v6 = vrot.slane %v794_v56, %v109_v15 }
  0x91   :  { %505 = vmatpush1.bf16.msra.mxu0 %v1028_v8  ;;  %756 = vmatpush1.bf16.msra.mxu1 %v1031_v9 }
 0x127   :  { %v206_v21 = vpop.f32.mrb[0].mxu0  ;;  %v249_v22 = vpop.f32.mrb[0].mxu1 }
 0x128   :  { %v207_v23 = vadd.f32 %v206_v21, %v106_v17  ;;  %v250_v24 = vadd.f32 %v249_v22, %v114_v18  ;;  %v208_v25 = vpop.f32.mrb[1].mxu0  ;;  %v251_v26 = vpop.f32.mrb[1].mxu1 }
 0x129   :  { %v209_v27 = vadd.f32 %v208_v25, %v110_v19  ;;  %v252_v28 = vadd.f32 %v251_v26, %v118_v20  ;;  %v210_v29 = vpop.f32.mrb[2].mxu0  ;;  %v253_v30 = vpop.f32.mrb[2].mxu1 }
 0x12a   :  { %v211_v31 = vadd.f32 %v210_v29, %v106_v17  ;;  %v254_v32 = vadd.f32 %v253_v30, %v114_v18  ;;  %v212_v33 = vpop.f32.mrb[3].mxu0  ;;  %v255_v34 = vpop.f32.mrb[3].mxu1  ;;  %v258_v37 = vmax.f32 %v207_v23, 0.0  ;;  %v260_v38 = vmax.f32 %v250_v24, 0.0 }
 0x12b   :  { %v213_v35 = vadd.f32 %v212_v33, %v110_v19  ;;  %v256_v36 = vadd.f32 %v255_v34, %v118_v20  ;;  %v259_v41 = vmax.f32 %v209_v27, 0.0  ;;  %v261_v42 = vmax.f32 %v252_v28, 0.0  ;;  %v913_v33 = vld [vmem:[%s1275_s9] ss:$0 sm:$0xff] }
 0x12c   :  { %v262_v39 = vmax.f32 %v211_v31, 0.0  ;;  %v264_v40 = vmax.f32 %v254_v32, 0.0 }
 0x12d   :  { %v263_v43 = vmax.f32 %v213_v35, 0.0  ;;  %v265_v44 = vmax.f32 %v256_v36, 0.0 }
 0x12e   :  { %v266_v45 = vpack.c.bf16 %v262_v39, %v258_v37  ;;  %v268_v46 = vpack.c.bf16 %v264_v40, %v260_v38 }
 0x12f   :  { %v267_v47 = vpack.c.bf16 %v263_v43, %v259_v41  ;;  %v269_v48 = vpack.c.bf16 %v265_v44, %v261_v42 }
 0x131   :  { %506 = vmatprep.mubr.bf16.mxu0 %v267_v47  ;;  %757 = vmatprep.mubr.bf16.mxu1 %v269_v48 }
 0x132   :  { %507 = vmatmul.mubr.bf16.vlgmr.msra.gmra.mrb[4].mxu0 %v266_v45  ;;  %758 = vmatmul.mubr.bf16.vlgmr.msra.gmra.mrb[4].mxu1 %v268_v46 }
 0x205   :  { %v508_v57 = vpop.f32.mrb[4].mxu0  ;;  %v759_v58 = vpop.f32.mrb[4].mxu1 }
 0x206   :  { %v509_v59 = vadd.f32 %v508_v57, %v307_v51  ;;  %v760_v60 = vadd.f32 %v759_v58, %v558_v52  ;;  %v510_v61 = vpop.f32.mrb[5].mxu0  ;;  %v761_v62 = vpop.f32.mrb[5].mxu1 }
 0x207   :  { %v511_v1 = vadd.f32 %v510_v61, %v311_v53  ;;  %v762_v2 = vadd.f32 %v761_v62, %v562_v54  ;;  %v512_v3 = vpop.f32.mrb[6].mxu0  ;;  %v763_v4 = vpop.f32.mrb[6].mxu1 }
 0x208   :  { %v517_v7 = vmax.f32 %v509_v59, 0.0  ;;  %v768_v8 = vmax.f32 %v760_v60, 0.0  ;;  %v513_v9 = vadd.f32 %v512_v3, %v307_v51  ;;  %v764_v10 = vadd.f32 %v763_v4, %v558_v52  ;;  %v514_v11 = vpop.f32.mrb[7].mxu0  ;;  %v765_v13 = vpop.f32.mrb[7].mxu1 }
 0x209   :  { %v518_v14 = vmax.f32 %v511_v1, 0.0  ;;  %v769_v16 = vmax.f32 %v762_v2, 0.0  ;;  %v515_v17 = vadd.f32 %v514_v11, %v311_v53  ;;  %v766_v18 = vadd.f32 %v765_v13, %v562_v54 }
 0x20a   :  { %v519_v19 = vmax.f32 %v513_v9, 0.0  ;;  %v770_v20 = vmax.f32 %v764_v10, 0.0  ;;  %v806_v21 = vmul.f32 %v799_v0, %v768_v8  ;;  %v784_v12 = vmul.f32 %v777_v63, %v517_v7 }
 0x20b   :  { %v520_v22 = vmax.f32 %v515_v17, 0.0  ;;  %v771_v23 = vmax.f32 %v766_v18, 0.0  ;;  %v807_v24 = vmul.f32 %v803_v6, %v769_v16  ;;  %v785_v25 = vmul.f32 %v781_v5, %v518_v14 }
 0x20c   :  { %v786_v26 = vmul.f32 %v777_v63, %v519_v19  ;;  %v808_v15 = vmul.f32 %v799_v0, %v770_v20 }
 0x20d   :  { %v787_v27 = vmul.f32 %v781_v5, %v520_v22  ;;  %v809_v28 = vmul.f32 %v803_v6, %v771_v23  ;;  %v810_v29 = vadd.f32 %v807_v24, %v806_v21  ;;  %v788_v30 = vadd.f32 %v785_v25, %v784_v12 }
 0x20f   :  { %811 = vadd.xlane.f32.xlu1 %v810_v29  ;;  %789 = vadd.xlane.f32.xlu0 %v788_v30  ;;  %v813_v31 = vadd.f32 %v809_v28, %v808_v15  ;;  %v791_v32 = vadd.f32 %v787_v27, %v786_v26 }
 0x213   :  { %814 = vadd.xlane.f32.xlu1 %v813_v31  ;;  %792 = vadd.xlane.f32.xlu0 %v791_v32 }
 0x29c   :  { %v812_v34 = vpop.xlane.xlu1 %811  ;;  %v790_v35 = vpop.xlane.xlu0 %789 }
 0x29d   :  { %v817_v36 = vsel %vm816_vm1, %v790_v35, %v812_v34 }
 0x29e   :  { %v826_v37 = vadd.f32 %v913_v33, %v817_v36 }
 0x2a0   :  { %829 = vst.msk [vmem:[%s1276_s10] sm:$0xff] %vm828_vm2, %v826_v37  ;;  %v815_v38 = vpop.xlane.xlu1 %814  ;;  %v793_v39 = vpop.xlane.xlu0 %792 }
 0x2a1   :  { %v818_v40 = vsel %vm816_vm1, %v793_v39, %v815_v38 }
 0x2a2   :  { %v827_v41 = vadd.f32 %v913_v33, %v818_v40 }
 0x2a4   :  { %830 = vst.msk [vmem:[%s1276_s10 + $0x8] sm:$0xff] %vm828_vm2, %v827_v41 }
 0x2a5   :  { %835 = vsyncpa [#allocation3], 1 }
 0x2a6   :  { %836 = vsyncpa [#allocation5], 1 }
 0x2a7   :  { %837 = vsyncpa [#allocation8], 1 }

</bundles_post_ra>
